<compile_context>
chip_gen: v7x
topology: tpu7x:2x2x1
jax: 0.10.0
libtpu: 0.0.40
codegen_flags: <defaults>
</compile_context>

<pallas_src>
import jax
import jax.numpy as jnp
from jax import lax
from jax.experimental import pallas as pl
from jax.experimental.pallas import tpu as pltpu

# ----- problem sizes (small, consistent with the module) ---------------------
N = 8          # num_nodes
D = 32         # embed_dim
H = 2          # num_heads
HD = D // H    # head_dim (multihead_agg='concat')
SCALE = HD ** (-0.5)
EPS = 1e-5     # nn.LayerNorm default eps

# packed "from-D" weight slab column layout: [qkv (3D) | wo (D) | w1 (4D)]
_QKV0 = 0
_WO0 = 3 * D          # 96
_W10 = 4 * D          # 128  (tile-aligned)
_WBIG_COLS = 8 * D    # 256


def _layernorm(x, gamma, beta):
    mu = jnp.mean(x, axis=-1, keepdims=True)
    var = jnp.mean((x - mu) ** 2, axis=-1, keepdims=True)
    return (x - mu) * lax.rsqrt(var + EPS) * gamma + beta


def attn_kernel(x_ref, wbig_ref, w2_ref, vec_ref, out_ref, attn_ref):
    x = x_ref[...]          # [N, D]
    wbig = wbig_ref[...]    # [D, 8D]   (pre-transposed, packed on host)
    vecs = vec_ref[...]     # [8, 128]  packed bias / LayerNorm vectors

    bo  = vecs[0:1, :D]     # out_proj bias
    g1  = vecs[1:2, :D]     # norm1 gamma
    be1 = vecs[2:3, :D]     # norm1 beta
    bb1 = vecs[3:4, :]      # ffn layer-1 bias [1, 4D]
    bb2 = vecs[4:5, :D]     # ffn layer-2 bias
    g2  = vecs[5:6, :D]     # norm2 gamma
    be2 = vecs[6:7, :D]     # norm2 beta

    # ---- fused Q/K/V projection: one MXU push -> [N, 3D] ----
    qkv = jnp.dot(x, wbig[:, _QKV0:_QKV0 + 3 * D],
                  preferred_element_type=jnp.float32)

    # ---- per-head attention, statically unrolled (H = 2), pure 2-D dots ----
    ctx_heads = []
    attn_heads = []
    for h in range(H):
        q_h = qkv[:, h * HD:(h + 1) * HD]                    # [N, HD]
        k_h = qkv[:, D + h * HD:D + (h + 1) * HD]            # [N, HD]
        v_h = qkv[:, 2 * D + h * HD:2 * D + (h + 1) * HD]    # [N, HD]

        # q_h @ k_h.T without materializing a transpose
        scores = lax.dot_general(
            q_h, k_h, (((1,), (1,)), ((), ())),
            preferred_element_type=jnp.float32) * SCALE      # [N, N]
        m = jnp.max(scores, axis=-1, keepdims=True)
        e = jnp.exp(scores - m)
        den = jnp.sum(e, axis=-1, keepdims=True)
        a = e * pl.reciprocal(den, approx=False)             # softmax (EUP recip)
        attn_heads.append(a)
        ctx_heads.append(jnp.dot(a, v_h,
                                 preferred_element_type=jnp.float32))  # [N, HD]

    ctx = jnp.concatenate(ctx_heads, axis=-1)                # [N, D] (concat heads)
    attn_ref[...] = jnp.concatenate(attn_heads, axis=-1)     # [N, H*N] packed

    # ---- output projection + residual + LayerNorm1 ----
    proj = jnp.dot(ctx, wbig[:, _WO0:_WO0 + D],
                   preferred_element_type=jnp.float32) + bo
    # dropout1 is identity (eval mode)
    h1 = _layernorm(x + proj, g1, be1)

    # ---- FFN (Linear -> ReLU -> Linear) + residual + LayerNorm2 ----
    f = jnp.dot(h1, wbig[:, _W10:_W10 + 4 * D],
                preferred_element_type=jnp.float32) + bb1
    f = jnp.maximum(f, 0.0)
    f = jnp.dot(f, w2_ref[...], preferred_element_type=jnp.float32) + bb2
    # dropout2 is identity (eval mode)
    out_ref[...] = _layernorm(h1 + f, g2, be2)


def pack_params(p):
    """Host-side, one-time packing: pre-transpose & concatenate weights,
    pack all small vectors into a single (8, 128) slab."""
    wbig = jnp.concatenate(
        [p['wq'].T, p['wk'].T, p['wv'].T, p['wo'].T, p['w1'].T],
        axis=1).astype(jnp.float32)                          # [D, 8D]
    w2t = p['w2'].T.astype(jnp.float32)                      # [4D, D]
    vecs = jnp.zeros((8, 128), jnp.float32)
    vecs = vecs.at[0, :D].set(p['bo'][0])
    vecs = vecs.at[1, :D].set(p['g1'][0])
    vecs = vecs.at[2, :D].set(p['be1'][0])
    vecs = vecs.at[3, :].set(p['bb1'][0])
    vecs = vecs.at[4, :D].set(p['bb2'][0])
    vecs = vecs.at[5, :D].set(p['g2'][0])
    vecs = vecs.at[6, :D].set(p['be2'][0])
    return {'wbig': wbig, 'w2t': w2t, 'vecs': vecs}


def mha_qk_forward(x, packed):
    out, attn_packed = pl.pallas_call(
        attn_kernel,
        out_shape=(jax.ShapeDtypeStruct((N, D), jnp.float32),
                   jax.ShapeDtypeStruct((N, H * N), jnp.float32)),
        in_specs=[pl.BlockSpec(memory_space=pltpu.MemorySpace.VMEM)] * 4,
        out_specs=(pl.BlockSpec(memory_space=pltpu.MemorySpace.VMEM),
                   pl.BlockSpec(memory_space=pltpu.MemorySpace.VMEM)),
    )(x, packed['wbig'], packed['w2t'], packed['vecs'])

    # attn_packed[n, h*N + m] == attn[h, n, m]
    attn = attn_packed.reshape(N, H, N).transpose(1, 0, 2)   # [H, N, N]
    return out, attn


def init_params(key):
    ks = jax.random.split(key, 12)
    s = 0.1
    return {
        # Linear weights stored [out, in] like PyTorch
        'wq': s * jax.random.normal(ks[0], (H * HD, D), jnp.float32),
        'wk': s * jax.random.normal(ks[1], (H * HD, D), jnp.float32),
        'wv': s * jax.random.normal(ks[2], (H * HD, D), jnp.float32),
        'wo': s * jax.random.normal(ks[3], (D, H * HD), jnp.float32),
        'bo': s * jax.random.normal(ks[4], (1, D), jnp.float32),
        'g1': jnp.ones((1, D), jnp.float32),
        'be1': jnp.zeros((1, D), jnp.float32),
        'w1': s * jax.random.normal(ks[5], (4 * D, D), jnp.float32),
        'bb1': s * jax.random.normal(ks[6], (1, 4 * D), jnp.float32),
        'w2': s * jax.random.normal(ks[7], (D, 4 * D), jnp.float32),
        'bb2': s * jax.random.normal(ks[8], (1, D), jnp.float32),
        'g2': jnp.ones((1, D), jnp.float32),
        'be2': jnp.zeros((1, D), jnp.float32),
        # attn_params exists in __init__ but is unused by forward (softmax path)
        'attn_params': s * jax.random.normal(ks[9], (H, N, N), jnp.float32),
    }


def ref_forward(x, p):
    """Pure-JAX reference mirroring the PyTorch forward (eval mode)."""
    q = (x @ p['wq'].T).reshape(N, H, HD).transpose(1, 0, 2)
    k = (x @ p['wk'].T).reshape(N, H, HD).transpose(1, 0, 2)
    v = (x @ p['wv'].T).reshape(N, H, HD).transpose(1, 0, 2)
    scores = jnp.einsum('hnd,hmd->hnm', q, k) * SCALE
    attn = jax.nn.softmax(scores, axis=-1)
    ctx = jnp.einsum('hnm,hmd->hnd', attn, v).transpose(1, 0, 2).reshape(N, H * HD)
    proj = ctx @ p['wo'].T + p['bo']
    h1 = _layernorm(x + proj, p['g1'], p['be1'])
    f = jnp.maximum(h1 @ p['w1'].T + p['bb1'], 0.0) @ p['w2'].T + p['bb2']
    out = _layernorm(h1 + f, p['g2'], p['be2'])
    return out, attn


if __name__ == "__main__":
    key = jax.random.PRNGKey(0)
    kx, kp = jax.random.split(key)
    x = jax.random.normal(kx, (N, D), jnp.float32)
    params = init_params(kp)
    packed = pack_params(params)          # one-time host-side weight packing

    out, attn = mha_qk_forward(x, packed)
    jax.block_until_ready((out, attn))

    ref_out, ref_attn = ref_forward(x, params)
    assert out.shape == (N, D) and attn.shape == (H, N, N)
    assert jnp.allclose(out, ref_out, atol=1e-4, rtol=1e-4)
    assert jnp.allclose(attn, ref_attn, atol=1e-5, rtol=1e-5)

    # TODO(synk): prior_guide branch (attn_weights := broadcast prior_guide) not
    # exercised; only the softmax-normalizer path is implemented.
    print("KERNEL_OK")
</pallas_src>

<mosaic_0001>
module attributes {stable_mosaic.version = 11 : i64} {
  func.func @attn_kernel(%arg0: memref<8x32xf32, #tpu.memory_space<vmem>>, %arg1: memref<32x256xf32, #tpu.memory_space<vmem>>, %arg2: memref<128x32xf32, #tpu.memory_space<vmem>>, %arg3: memref<8x128xf32, #tpu.memory_space<vmem>>, %arg4: memref<8x32xf32, #tpu.memory_space<vmem>>, %arg5: memref<8x16xf32, #tpu.memory_space<vmem>>) attributes {dimension_semantics = [], scalar_prefetch = 0 : i64, scratch_operands = 0 : i64, tpu.core_type = #tpu.core_type<tc>} {
    %c0 = arith.constant 0 : index
    %c0_0 = arith.constant 0 : index
    %0 = vector.load %arg0[%c0, %c0_0] : memref<8x32xf32, #tpu.memory_space<vmem>>, vector<8x32xf32>
    %c0_1 = arith.constant 0 : index
    %c0_2 = arith.constant 0 : index
    %1 = vector.load %arg1[%c0_1, %c0_2] : memref<32x256xf32, #tpu.memory_space<vmem>>, vector<32x256xf32>
    %c0_3 = arith.constant 0 : index
    %c0_4 = arith.constant 0 : index
    %2 = vector.load %arg3[%c0_3, %c0_4] : memref<8x128xf32, #tpu.memory_space<vmem>>, vector<8x128xf32>
    %3 = vector.extract_strided_slice %2 {offsets = [0, 0], sizes = [1, 32], strides = [1, 1]} : vector<8x128xf32> to vector<1x32xf32>
    %4 = vector.extract_strided_slice %2 {offsets = [1, 0], sizes = [1, 32], strides = [1, 1]} : vector<8x128xf32> to vector<1x32xf32>
    %5 = vector.extract_strided_slice %2 {offsets = [2, 0], sizes = [1, 32], strides = [1, 1]} : vector<8x128xf32> to vector<1x32xf32>
    %6 = vector.extract_strided_slice %2 {offsets = [3, 0], sizes = [1, 128], strides = [1, 1]} : vector<8x128xf32> to vector<1x128xf32>
    %7 = vector.extract_strided_slice %2 {offsets = [4, 0], sizes = [1, 32], strides = [1, 1]} : vector<8x128xf32> to vector<1x32xf32>
    %8 = vector.extract_strided_slice %2 {offsets = [5, 0], sizes = [1, 32], strides = [1, 1]} : vector<8x128xf32> to vector<1x32xf32>
    %9 = vector.extract_strided_slice %2 {offsets = [6, 0], sizes = [1, 32], strides = [1, 1]} : vector<8x128xf32> to vector<1x32xf32>
    %10 = vector.extract_strided_slice %1 {offsets = [0, 0], sizes = [32, 96], strides = [1, 1]} : vector<32x256xf32> to vector<32x96xf32>
    %cst = arith.constant dense<0.000000e+00> : vector<8x96xf32>
    %11 = tpu.matmul %0, %10, %cst {dimension_numbers = #tpu.dot_dimension_numbers<[1], [0], [0], [1], [0, 0, 1, 1], [], []>} : vector<8x32xf32>, vector<32x96xf32>, vector<8x96xf32> -> vector<8x96xf32>
    %12 = vector.extract_strided_slice %11 {offsets = [0, 0], sizes = [8, 16], strides = [1, 1]} : vector<8x96xf32> to vector<8x16xf32>
    %13 = vector.extract_strided_slice %11 {offsets = [0, 32], sizes = [8, 16], strides = [1, 1]} : vector<8x96xf32> to vector<8x16xf32>
    %14 = vector.extract_strided_slice %11 {offsets = [0, 64], sizes = [8, 16], strides = [1, 1]} : vector<8x96xf32> to vector<8x16xf32>
    %cst_5 = arith.constant dense<0.000000e+00> : vector<8x8xf32>
    %15 = tpu.matmul %12, %13, %cst_5 {dimension_numbers = #tpu.dot_dimension_numbers<[1], [1], [0], [0], [0, 0, 1, 0], [], []>} : vector<8x16xf32>, vector<8x16xf32>, vector<8x8xf32> -> vector<8x8xf32>
    %cst_6 = arith.constant 2.500000e-01 : f32
    %16 = vector.broadcast %cst_6 : f32 to vector<8x8xf32>
    %17 = arith.mulf %15, %16 : vector<8x8xf32>
    %cst_7 = arith.constant dense<0xFF800000> : vector<8xf32>
    %18 = vector.multi_reduction <maximumf>, %17, %cst_7 [1] : vector<8x8xf32> to vector<8xf32>
    %19 = vector.shape_cast %18 : vector<8xf32> to vector<8x1xf32>
    %20 = vector.broadcast %19 : vector<8x1xf32> to vector<8x8xf32>
    %21 = arith.subf %17, %20 : vector<8x8xf32>
    %22 = math.exp %21 : vector<8x8xf32>
    %cst_8 = arith.constant dense<0.000000e+00> : vector<8xf32>
    %23 = vector.multi_reduction <add>, %22, %cst_8 [1] : vector<8x8xf32> to vector<8xf32>
    %24 = vector.shape_cast %23 : vector<8xf32> to vector<8x1xf32>
    %25 = tpu.reciprocal %24 : vector<8x1xf32> -> vector<8x1xf32>
    %26 = vector.broadcast %25 : vector<8x1xf32> to vector<8x8xf32>
    %27 = arith.mulf %22, %26 : vector<8x8xf32>
    %cst_9 = arith.constant dense<0.000000e+00> : vector<8x16xf32>
    %28 = tpu.matmul %27, %14, %cst_9 {dimension_numbers = #tpu.dot_dimension_numbers<[1], [0], [0], [1], [0, 0, 1, 1], [], []>} : vector<8x8xf32>, vector<8x16xf32>, vector<8x16xf32> -> vector<8x16xf32>
    %29 = vector.extract_strided_slice %11 {offsets = [0, 16], sizes = [8, 16], strides = [1, 1]} : vector<8x96xf32> to vector<8x16xf32>
    %30 = vector.extract_strided_slice %11 {offsets = [0, 48], sizes = [8, 16], strides = [1, 1]} : vector<8x96xf32> to vector<8x16xf32>
    %31 = vector.extract_strided_slice %11 {offsets = [0, 80], sizes = [8, 16], strides = [1, 1]} : vector<8x96xf32> to vector<8x16xf32>
    %cst_10 = arith.constant dense<0.000000e+00> : vector<8x8xf32>
    %32 = tpu.matmul %29, %30, %cst_10 {dimension_numbers = #tpu.dot_dimension_numbers<[1], [1], [0], [0], [0, 0, 1, 0], [], []>} : vector<8x16xf32>, vector<8x16xf32>, vector<8x8xf32> -> vector<8x8xf32>
    %cst_11 = arith.constant 2.500000e-01 : f32
    %33 = vector.broadcast %cst_11 : f32 to vector<8x8xf32>
    %34 = arith.mulf %32, %33 : vector<8x8xf32>
    %cst_12 = arith.constant dense<0xFF800000> : vector<8xf32>
    %35 = vector.multi_reduction <maximumf>, %34, %cst_12 [1] : vector<8x8xf32> to vector<8xf32>
    %36 = vector.shape_cast %35 : vector<8xf32> to vector<8x1xf32>
    %37 = vector.broadcast %36 : vector<8x1xf32> to vector<8x8xf32>
    %38 = arith.subf %34, %37 : vector<8x8xf32>
    %39 = math.exp %38 : vector<8x8xf32>
    %cst_13 = arith.constant dense<0.000000e+00> : vector<8xf32>
    %40 = vector.multi_reduction <add>, %39, %cst_13 [1] : vector<8x8xf32> to vector<8xf32>
    %41 = vector.shape_cast %40 : vector<8xf32> to vector<8x1xf32>
    %42 = tpu.reciprocal %41 : vector<8x1xf32> -> vector<8x1xf32>
    %43 = vector.broadcast %42 : vector<8x1xf32> to vector<8x8xf32>
    %44 = arith.mulf %39, %43 : vector<8x8xf32>
    %cst_14 = arith.constant dense<0.000000e+00> : vector<8x16xf32>
    %45 = tpu.matmul %44, %31, %cst_14 {dimension_numbers = #tpu.dot_dimension_numbers<[1], [0], [0], [1], [0, 0, 1, 1], [], []>} : vector<8x8xf32>, vector<8x16xf32>, vector<8x16xf32> -> vector<8x16xf32>
    %46 = tpu.concatenate %28, %45 in 1 : vector<8x16xf32>, vector<8x16xf32> -> vector<8x32xf32>
    %47 = tpu.concatenate %27, %44 in 1 : vector<8x8xf32>, vector<8x8xf32> -> vector<8x16xf32>
    %c0_15 = arith.constant 0 : index
    %c0_16 = arith.constant 0 : index
    %48 = vector.load %arg5[%c0_15, %c0_16] : memref<8x16xf32, #tpu.memory_space<vmem>>, vector<8x16xf32>
    tpu.vector_store %arg5[%c0_15, %c0_16], %47 {strides = array<i32>} : memref<8x16xf32, #tpu.memory_space<vmem>>, vector<8x16xf32>,
    %49 = vector.extract_strided_slice %1 {offsets = [0, 96], sizes = [32, 32], strides = [1, 1]} : vector<32x256xf32> to vector<32x32xf32>
    %cst_17 = arith.constant dense<0.000000e+00> : vector<8x32xf32>
    %50 = tpu.matmul %46, %49, %cst_17 {dimension_numbers = #tpu.dot_dimension_numbers<[1], [0], [0], [1], [0, 0, 1, 1], [], []>} : vector<8x32xf32>, vector<32x32xf32>, vector<8x32xf32> -> vector<8x32xf32>
    %51 = vector.broadcast %3 : vector<1x32xf32> to vector<8x32xf32>
    %52 = arith.addf %50, %51 : vector<8x32xf32>
    %53 = arith.addf %0, %52 : vector<8x32xf32>
    %cst_18 = arith.constant dense<0.000000e+00> : vector<8xf32>
    %54 = vector.multi_reduction <add>, %53, %cst_18 [1] : vector<8x32xf32> to vector<8xf32>
    %55 = vector.shape_cast %54 : vector<8xf32> to vector<8x1xf32>
    %cst_19 = arith.constant 3.200000e+01 : f32
    %56 = vector.broadcast %cst_19 : f32 to vector<8x1xf32>
    %57 = arith.divf %55, %56 : vector<8x1xf32>
    %58 = vector.broadcast %57 : vector<8x1xf32> to vector<8x32xf32>
    %59 = arith.subf %53, %58 : vector<8x32xf32>
    %60 = arith.mulf %59, %59 : vector<8x32xf32>
    %cst_20 = arith.constant dense<0.000000e+00> : vector<8xf32>
    %61 = vector.multi_reduction <add>, %60, %cst_20 [1] : vector<8x32xf32> to vector<8xf32>
    %62 = vector.shape_cast %61 : vector<8xf32> to vector<8x1xf32>
    %cst_21 = arith.constant 3.200000e+01 : f32
    %63 = vector.broadcast %cst_21 : f32 to vector<8x1xf32>
    %64 = arith.divf %62, %63 : vector<8x1xf32>
    %65 = vector.broadcast %57 : vector<8x1xf32> to vector<8x32xf32>
    %66 = arith.subf %53, %65 : vector<8x32xf32>
    %cst_22 = arith.constant 9.99999974E-6 : f32
    %67 = vector.broadcast %cst_22 : f32 to vector<8x1xf32>
    %68 = arith.addf %64, %67 : vector<8x1xf32>
    %69 = math.rsqrt %68 : vector<8x1xf32>
    %70 = vector.broadcast %69 : vector<8x1xf32> to vector<8x32xf32>
    %71 = arith.mulf %66, %70 : vector<8x32xf32>
    %72 = vector.broadcast %4 : vector<1x32xf32> to vector<8x32xf32>
    %73 = arith.mulf %71, %72 : vector<8x32xf32>
    %74 = vector.broadcast %5 : vector<1x32xf32> to vector<8x32xf32>
    %75 = arith.addf %73, %74 : vector<8x32xf32>
    %76 = vector.extract_strided_slice %1 {offsets = [0, 128], sizes = [32, 128], strides = [1, 1]} : vector<32x256xf32> to vector<32x128xf32>
    %cst_23 = arith.constant dense<0.000000e+00> : vector<8x128xf32>
    %77 = tpu.matmul %75, %76, %cst_23 {dimension_numbers = #tpu.dot_dimension_numbers<[1], [0], [0], [1], [0, 0, 1, 1], [], []>} : vector<8x32xf32>, vector<32x128xf32>, vector<8x128xf32> -> vector<8x128xf32>
    %78 = vector.broadcast %6 : vector<1x128xf32> to vector<8x128xf32>
    %79 = arith.addf %77, %78 : vector<8x128xf32>
    %cst_24 = arith.constant 0.000000e+00 : f32
    %80 = vector.broadcast %cst_24 : f32 to vector<8x128xf32>
    %81 = arith.maximumf %79, %80 : vector<8x128xf32>
    %c0_25 = arith.constant 0 : index
    %c0_26 = arith.constant 0 : index
    %82 = vector.load %arg2[%c0_25, %c0_26] : memref<128x32xf32, #tpu.memory_space<vmem>>, vector<128x32xf32>
    %cst_27 = arith.constant dense<0.000000e+00> : vector<8x32xf32>
    %83 = tpu.matmul %81, %82, %cst_27 {dimension_numbers = #tpu.dot_dimension_numbers<[1], [0], [0], [1], [0, 0, 1, 1], [], []>} : vector<8x128xf32>, vector<128x32xf32>, vector<8x32xf32> -> vector<8x32xf32>
    %84 = vector.broadcast %7 : vector<1x32xf32> to vector<8x32xf32>
    %85 = arith.addf %83, %84 : vector<8x32xf32>
    %86 = arith.addf %75, %85 : vector<8x32xf32>
    %cst_28 = arith.constant dense<0.000000e+00> : vector<8xf32>
    %87 = vector.multi_reduction <add>, %86, %cst_28 [1] : vector<8x32xf32> to vector<8xf32>
    %88 = vector.shape_cast %87 : vector<8xf32> to vector<8x1xf32>
    %cst_29 = arith.constant 3.200000e+01 : f32
    %89 = vector.broadcast %cst_29 : f32 to vector<8x1xf32>
    %90 = arith.divf %88, %89 : vector<8x1xf32>
    %91 = vector.broadcast %90 : vector<8x1xf32> to vector<8x32xf32>
    %92 = arith.subf %86, %91 : vector<8x32xf32>
    %93 = arith.mulf %92, %92 : vector<8x32xf32>
    %cst_30 = arith.constant dense<0.000000e+00> : vector<8xf32>
    %94 = vector.multi_reduction <add>, %93, %cst_30 [1] : vector<8x32xf32> to vector<8xf32>
    %95 = vector.shape_cast %94 : vector<8xf32> to vector<8x1xf32>
    %cst_31 = arith.constant 3.200000e+01 : f32
    %96 = vector.broadcast %cst_31 : f32 to vector<8x1xf32>
    %97 = arith.divf %95, %96 : vector<8x1xf32>
    %98 = vector.broadcast %90 : vector<8x1xf32> to vector<8x32xf32>
    %99 = arith.subf %86, %98 : vector<8x32xf32>
    %cst_32 = arith.constant 9.99999974E-6 : f32
    %100 = vector.broadcast %cst_32 : f32 to vector<8x1xf32>
    %101 = arith.addf %97, %100 : vector<8x1xf32>
    %102 = math.rsqrt %101 : vector<8x1xf32>
    %103 = vector.broadcast %102 : vector<8x1xf32> to vector<8x32xf32>
    %104 = arith.mulf %99, %103 : vector<8x32xf32>
    %105 = vector.broadcast %8 : vector<1x32xf32> to vector<8x32xf32>
    %106 = arith.mulf %104, %105 : vector<8x32xf32>
    %107 = vector.broadcast %9 : vector<1x32xf32> to vector<8x32xf32>
    %108 = arith.addf %106, %107 : vector<8x32xf32>
    %c0_33 = arith.constant 0 : index
    %c0_34 = arith.constant 0 : index
    %109 = vector.load %arg4[%c0_33, %c0_34] : memref<8x32xf32, #tpu.memory_space<vmem>>, vector<8x32xf32>
    tpu.vector_store %arg4[%c0_33, %c0_34], %108 {strides = array<i32>} : memref<8x32xf32, #tpu.memory_space<vmem>>, vector<8x32xf32>,
    return
  }
}

</mosaic_0001>

<bundles_post_ra>
// kernel: tpu_custom_call.1
= control target key start
LH: loop header
LB: loop body
LE: loop exit
PB: predicated region body
PF: predicated region fallthrough
CT: control target
= control target key end

     0   :  { %11 = vsyncpa [#allocation3], 0  ;;  %v1049_v3 = vmov 0.0|0.0   ;;  %vm1050_vm0 = vmmov 0   ;;  %v1051_v7 = vmov 0.0   ;;  %s1294_s0 = inlined_call_operand.vmem [shape: f32[8,32], index: 0, kind: input, shape index: {}]   ;;  %s1295_s1 = inlined_call_operand.vmem [shape: f32[32,256], index: 1, kind: input, shape index: {}]   ;;  %s1296_s2 = inlined_call_operand.vmem [shape: f32[128,32], index: 2, kind: input, shape index: {}]   ;;  %s1297_s3 = inlined_call_operand.vmem [shape: f32[8,128], index: 3, kind: input, shape index: {}]   ;;  %s1298_s4 = inlined_call_operand.hbm [shape: f32[8,32], index: 4, kind: output, shape index: {0}]   ;;  %s1299_s5 = inlined_call_operand.hbm [shape: f32[8,16], index: 5, kind: output, shape index: {1}]  }
   0x1   :  { %v1095_v0 = vld [vmem:[%s1295_s1] sm:$0xff]  ;;  %v1100_v1 = vld [vmem:[%s1295_s1 + $0x10] sm:$0xff]  ;;  %924 = vmatprep.subr.bf16.mxu1 %v1049_v3  ;;  %844 = vmatprep.mubr.msk.f32.mxu1 %vm1050_vm0, %v1051_v7 }
   0x2   :  { %v1105_v2 = vld [vmem:[%s1295_s1 + $0x20] sm:$0xff]  ;;  %v979_v4 = vpack.i.bf16 %v1100_v1, %v1095_v0  ;;  %v925_v5 = vpack.c.bf16 %v1100_v1, %v1095_v0  ;;  %v1115_v6 = vld [vmem:[%s1295_s1 + $0x30] sm:$0xff] }
   0x3   :  { %12 = vsyncpa [#allocation5], 0  ;;  %857 = vmatprep.subr.mxu0 %v1051_v7  ;;  %859 = vmatprep.mubr.msk.f32.mxu0 %vm1050_vm0, %v1051_v7  ;;  %v928_v8 = vpack.c.bf16 %v1115_v6, %v1105_v2  ;;  %v1128_v9 = vld [vmem:[%s1294_s0] sm:$0xff]  ;;  %vm31_vm1 = vcmask 261120   ;;  %s1052_s28 = smov 112   ;;  %s1053_s29 = smov 96   ;;  %v984_v33 = vpack.i.bf16 %v1115_v6, %v1105_v2  ;;  %v448_v56 = vlaneseq }
   0x4   :  { %926 = vmatpush3.bf16.msra.mxu1 %v925_v5  ;;  %s1054_s30 = smov 80   ;;  %vm108_vm2 = vcmask 130048   ;;  %vm184_vm3 = vcmask 64512   ;;  %s1055_s0 = smov 48   ;;  %v1177_v59 = vld [vmem:[%s1297_s3] sm:$0xff] }
   0x5   :  { %927 = vmatprep.subr.bf16.mxu1 %v1049_v3  ;;  %s1056_s6 = smov 64   ;;  %s1057_s7 = smov 32   ;;  %v1171_v57 = vshrl.u32 %v448_v56, 7 }
   0x6   :  { %s1058_s8 = smov 16   ;;  %s1059_s11 = smov 8  }
   0x7   :  { %v450_v58 = vsub.s32 0, %v1171_v57  ;;  %v662_v56 = vsub.s32 4, %v1171_v57 }
   0x8   :  { %929 = vmatpush3.bf16.msra.mxu1 %v928_v8  ;;  %v23_v8 = vld [vmem:[%s1295_s1 + $0x8] sm:$0xff] }
   0x9   :  { %847 = vmatprep.subr.mxu1 %v1051_v7  ;;  %v451_v60 = vrot.slane %v1177_v59, %v450_v58  ;;  %v663_v58 = vrot.slane %v1177_v59, %v662_v56 }
   0xb   :  { %845 = vmatmul.mubr.msk.f32.vlgmr.msra.gmra.mrb[0].mxu1 %vm31_vm1, %v1128_v9 }
   0xc   :  { %849 = vmatprep.mubr.msk.f32.mxu1 %vm1050_vm0, %v1051_v7 }
  0xde   :  { %v101_v10 = vpop.f32.mrb[0].mxu1 }
  0xdf   :  { %272 = vrot.lane.b32.xlu1 %v101_v10, %s1052_s28  ;;  %106 = vrot.lane.b32.xlu0 %v101_v10, %s1053_s29  ;;  %v846_v11 = vpop.f32.mrb[1].mxu1 }
  0xe0   :  { %v27_v11 = vld [vmem:[%s1295_s1 + $0x28] sm:$0xff] }
  0xe3   :  { %274 = vrot.lane.b32.xlu0 %v101_v10, %s1054_s30 }
 0x151   :  { %v107_v12 = vpop.permute.xlu0 %106  ;;  %v273_v14 = vpop.permute.xlu1 %272 }
 0x152   :  { %848 = vmatpush3.xpose.msk.msra.mxu1 %vm108_vm2, %v107_v12  ;;  %v29_v12 = vld [vmem:[%s1295_s1 + $0x38] sm:$0xff] }
 0x153   :  { %852 = vmatprep.subr.mxu1 %v1051_v7 }
 0x155   :  { %850 = vmatmul.mubr.msk.f32.vlgmr.msra.gmra.mrb[2].mxu1 %vm108_vm2, %v101_v10  ;;  %v275_v13 = vpop.permute.xlu0 %274 }
 0x156   :  { %858 = vmatpush3.xpose.msk.msra.mxu0 %vm108_vm2, %v275_v13  ;;  %854 = vmatprep.mubr.msk.f32.mxu1 %vm1050_vm0, %v1051_v7  ;;  %v940_v13 = vpack.c.bf16 %v29_v12, %v27_v11 }
 0x157   :  { %942 = vmatprep.subr.bf16.mxu0 %v1049_v3 }
 0x159   :  { %860 = vmatmul.mubr.msk.f32.vlgmr.msra.gmra.mrb[0].mxu0 %vm108_vm2, %v273_v14  ;;  %v644_v14 = vld [vmem:[%s1296_s2] sm:$0xff] }
 0x15a   :  { %921 = vmatprep.mubr.msk.f32.mxu0 %vm1050_vm0, %v1051_v7 }
 0x228   :  { %v179_v15 = vpop.f32.mrb[2].mxu1 }
 0x229   :  { %v183_v16 = vmul.f32 0.25, %v179_v15  ;;  %v851_v17 = vpop.f32.mrb[3].mxu1  ;;  %v645_v15 = vld [vmem:[%s1296_s2 + $0x8] sm:$0xff] }
 0x22a   :  { %v943_v17 = vpack.c.bf16 %v645_v15, %v644_v14 }
 0x22b   :  { %v185_v18 = vsel %vm184_vm3, %v183_v16, -inf }
 0x22c   :  { %v346_v19 = vpop.f32.mrb[0].mxu0  ;;  %186 = vmax.xlane.f32.xlu1 %v185_v18  ;;  %v647_v18 = vld [vmem:[%s1296_s2 + $0x18] sm:$0xff]  ;;  %944 = vmatpush3.bf16.msra.mxu0 %v943_v17 }
 0x22d   :  { %v350_v20 = vmul.f32 0.25, %v346_v19  ;;  %v861_v21 = vpop.f32.mrb[1].mxu0  ;;  %945 = vmatprep.subr.bf16.mxu0 %v1049_v3 }
 0x22e   :  { %v649_v21 = vld [vmem:[%s1296_s2 + $0x28] sm:$0xff] }
 0x22f   :  { %v351_v22 = vsel %vm184_vm3, %v350_v20, -inf }
 0x230   :  { %352 = vmax.xlane.f32.xlu0 %v351_v22 }
 0x2b9   :  { %v187_v23 = vpop.xlane.xlu1 %186 }
 0x2ba   :  { %v188_v24 = vsub.f32 %v183_v16, %v187_v23  ;;  %v646_v16 = vld [vmem:[%s1296_s2 + $0x10] sm:$0xff] }
 0x2bb   :  { %v946_v19 = vpack.c.bf16 %v647_v18, %v646_v16  ;;  %v650_v23 = vld [vmem:[%s1296_s2 + $0x30] sm:$0xff] }
 0x2bc   :  { %v189_v25 = vmul.f32 1.442695, %v188_v24  ;;  %v651_v24 = vld [vmem:[%s1296_s2 + $0x38] sm:$0xff] }
 0x2bd   :  { %v353_v26 = vpop.xlane.xlu0 %352  ;;  %947 = vmatpush3.bf16.msra.mxu0 %v946_v19 }
 0x2be   :  { %989 = vpow2.f32 %v189_v25  ;;  %v354_v27 = vsub.f32 %v350_v20, %v353_v26  ;;  %v648_v20 = vld [vmem:[%s1296_s2 + $0x20] sm:$0xff]  ;;  %948 = vmatprep.subr.bf16.mxu0 %v1049_v3  ;;  %v952_v25 = vpack.c.bf16 %v651_v24, %v650_v23 }
 0x2bf   :  { %v949_v22 = vpack.c.bf16 %v649_v21, %v648_v20  ;;  %v652_v26 = vld [vmem:[%s1296_s2 + $0x40] sm:$0xff] }
 0x2c0   :  { %v355_v28 = vmul.f32 1.442695, %v354_v27  ;;  %v653_v27 = vld [vmem:[%s1296_s2 + $0x48] sm:$0xff] }
 0x2c1   :  { %950 = vmatpush3.bf16.msra.mxu0 %v949_v22 }
 0x2c2   :  { %991 = vpow2.f32 %v355_v28  ;;  %951 = vmatprep.subr.bf16.mxu0 %v1049_v3  ;;  %v955_v28 = vpack.c.bf16 %v653_v27, %v652_v26 }
 0x2c5   :  { %953 = vmatpush3.bf16.msra.mxu0 %v952_v25 }
 0x2c6   :  { %954 = vmatprep.subr.bf16.mxu0 %v1049_v3 }
 0x2c8   :  { %v990_v29 = vpop.eup %989 }
 0x2c9   :  { %v191_v30 = vsel %vm184_vm3, %v990_v29, 0.0  ;;  %956 = vmatpush3.bf16.msra.mxu0 %v955_v28 }
 0x2ca   :  { %192 = vadd.xlane.f32.xlu0 %v191_v30  ;;  %v655_v30 = vld [vmem:[%s1296_s2 + $0x58] sm:$0xff]  ;;  %957 = vmatprep.subr.bf16.mxu0 %v1049_v3 }
 0x2cc   :  { %v992_v31 = vpop.eup %991 }
 0x2cd   :  { %v357_v32 = vsel %vm184_vm3, %v992_v31, 0.0 }
 0x2ce   :  { %358 = vadd.xlane.f32.xlu1 %v357_v32  ;;  %v656_v32 = vld [vmem:[%s1296_s2 + $0x60] sm:$0xff] }
 0x2df   :  { %362 = vrot.lane.b32.xlu1 %v101_v10, %s1055_s0 }
 0x2e0   :  { %196 = vrot.lane.b32.xlu0 %v101_v10, %s1056_s6 }
 0x2e3   :  { %980 = vrot.lane.b32.xlu1 %v979_v4, %s1057_s7 }
 0x2e4   :  { %985 = vrot.lane.b32.xlu0 %v984_v33, %s1057_s7  ;;  %v657_v33 = vld [vmem:[%s1296_s2 + $0x68] sm:$0xff] }
 0x357   :  { %v193_v34 = vpop.xlane.xlu0 %192 }
 0x358   :  { %993 = vrcp.f32 %v193_v34  ;;  %v961_v34 = vpack.c.bf16 %v657_v33, %v656_v32 }
 0x35b   :  { %v197_v35 = vpop.permute.xlu0 %196  ;;  %v359_v36 = vpop.xlane.xlu1 %358 }
 0x35c   :  { %995 = vrcp.f32 %v359_v36  ;;  %853 = vmatpush3.msra.mxu1 %v197_v35 }
 0x35d   :  { %862 = vmatprep.subr.mxu1 %v1051_v7 }
 0x35f   :  { %v363_v39 = vpop.permute.xlu1 %362  ;;  %v986_v43 = vpop.permute.xlu0 %985 }
 0x360   :  { %v988_v46 = vunpack.i.h.bf16 %v986_v43  ;;  %v987_v47 = vunpack.i.l.bf16 %v986_v43 }
 0x362   :  { %v994_v37 = vpop.eup %993  ;;  %v934_v49 = vpack.c.bf16 %v988_v46, %v987_v47 }
 0x363   :  { %v1155_v38 = vmul.f32 %v994_v37, %v990_v29  ;;  %v981_v42 = vpop.permute.xlu1 %980  ;;  %v654_v29 = vld [vmem:[%s1296_s2 + $0x50] sm:$0xff] }
 0x364   :  { %v983_v44 = vunpack.i.h.bf16 %v981_v42  ;;  %v982_v45 = vunpack.i.l.bf16 %v981_v42  ;;  %v563_v42 = vsub.s32 2, %v1171_v57 }
 0x365   :  { %855 = vmatmul.mubr.msk.f32.vlgmr.msra.gmra.mrb[4].mxu1 %vm184_vm3, %v1155_v38 }
 0x366   :  { %v996_v40 = vpop.eup %995  ;;  %863 = vmatpush3.msra.mxu1 %v363_v39  ;;  %864 = vmatprep.mubr.msk.f32.mxu1 %vm1050_vm0, %v1051_v7  ;;  %v931_v48 = vpack.c.bf16 %v983_v44, %v982_v45 }
 0x367   :  { %v361_v41 = vmul.f32 %v996_v40, %v992_v31  ;;  %930 = vmatprep.subr.bf16.mxu1 %v1049_v3  ;;  %v958_v31 = vpack.c.bf16 %v655_v30, %v654_v29 }
 0x369   :  { %865 = vmatmul.mubr.msk.f32.vlgmr.msra.gmra.mrb[6].mxu1 %vm184_vm3, %v361_v41  ;;  %959 = vmatpush3.bf16.msra.mxu0 %v958_v31 }
 0x36a   :  { %875 = vmatprep.mubr.msk.f32.mxu1 %vm1050_vm0, %v1051_v7  ;;  %932 = vmatpush3.bf16.msra.mxu1 %v931_v48  ;;  %v659_v48 = vld [vmem:[%s1296_s2 + $0x78] sm:$0xff] }
 0x36b   :  { %933 = vmatprep.subr.bf16.mxu1 %v1049_v3  ;;  %960 = vmatprep.subr.bf16.mxu0 %v1049_v3 }
 0x36d   :  { %962 = vmatpush3.bf16.msra.mxu0 %v961_v34 }
 0x36e   :  { %935 = vmatpush3.bf16.msra.mxu1 %v934_v49  ;;  %963 = vmatprep.subr.bf16.mxu0 %v1049_v3 }
 0x36f   :  { %936 = vmatprep.subr.bf16.mxu1 %v1049_v3 }
 0x438   :  { %v268_v50 = vpop.f32.mrb[4].mxu1 }
 0x439   :  { %v856_v51 = vpop.f32.mrb[5].mxu1 }
 0x43c   :  { %v434_v52 = vpop.f32.mrb[6].mxu1 }
 0x43d   :  { %439 = vrot.lane.b32.xlu1 %v434_v52, %s1058_s8  ;;  %v866_v53 = vpop.f32.mrb[7].mxu1 }
 0x4af   :  { %v440_v54 = vpop.permute.xlu1 %439 }
 0x4b0   :  { %v442_v55 = vsel %vm108_vm2, %v268_v50, %v440_v54  ;;  %v568_v50 = vsub.s32 3, %v1171_v57 }
 0x4b1   :  { %876 = vmatmul.mubr.msk.f32.vlgmr.msra.gmra.mrb[8].mxu1 %vm31_vm1, %v442_v55 }
 0x4b2   :  { %886 = vmatprep.mubr.msk.f32.mxu1 %vm1050_vm0, %v1051_v7  ;;  %v569_v51 = vrot.slane %v1177_v59, %v568_v50 }
 0x584   :  { %v537_v61 = vpop.f32.mrb[8].mxu1 }
 0x585   :  { %v538_v62 = vadd.f32 %v537_v61, %v451_v60  ;;  %v877_v63 = vpop.f32.mrb[9].mxu1 }
 0x587   :  { %v541_v0 = vadd.f32 %v538_v62, %v1128_v9  ;;  %v25_v9 = vld [vmem:[%s1295_s1 + $0x18] sm:$0xff] }
 0x588   :  { %v937_v10 = vpack.c.bf16 %v25_v9, %v23_v8 }
 0x589   :  { %v542_v1 = vsel %vm31_vm1, %v541_v0, 0.0 }
 0x58a   :  { %543 = vadd.xlane.f32.xlu0 %v542_v1  ;;  %938 = vmatpush3.bf16.msra.mxu1 %v937_v10 }
 0x58b   :  { %939 = vmatprep.subr.bf16.mxu1 %v1049_v3  ;;  %v564_v3 = vrot.slane %v1177_v59, %v563_v42 }
 0x58e   :  { %941 = vmatpush3.bf16.msra.mxu1 %v940_v13 }
 0x617   :  { %v544_v2 = vpop.xlane.xlu0 %543 }
 0x618   :  { %v546_v4 = vmul.f32 0.03125, %v544_v2 }
 0x61a   :  { %v547_v5 = vsub.f32 %v541_v0, %v546_v4 }
 0x61c   :  { %v548_v6 = vmul.f32 %v547_v5, %v547_v5 }
 0x61e   :  { %v549_v7 = vsel %vm31_vm1, %v548_v6, 0.0 }
 0x61f   :  { %550 = vadd.xlane.f32.xlu1 %v549_v7 }
 0x630   :  { %443 = vrot.lane.b32.xlu1 %v361_v41, %s1059_s11  ;;  %v558_v41 = vsub.s32 1, %v1171_v57 }
 0x632   :  { %v559_v43 = vrot.slane %v1177_v59, %v558_v41 }
 0x6ac   :  { %v551_v35 = vpop.xlane.xlu1 %550 }
 0x6ad   :  { %v552_v36 = vmul.f32 0.03125, %v551_v35 }
 0x6af   :  { %v553_v37 = vadd.f32 1e-05, %v552_v36 }
 0x6b0   :  { %v444_v39 = vpop.permute.xlu1 %443 }
 0x6b1   :  { %997 = vrsqrt.f32 %v553_v37  ;;  %v446_v40 = vsel %vm184_vm3, %v1155_v38, %v444_v39  ;;  %v658_v38 = vld [vmem:[%s1296_s2 + $0x70] sm:$0xff]  ;;  %s1060_s2 = smov [#allocation4]  }
 0x6b2   :  { %447 = vst.msk [vmem:[#allocation4] sm:$0xff] %vm108_vm2, %v446_v40  ;;  %v964_v49 = vpack.c.bf16 %v659_v48, %v658_v38  ;;  %s775_s23 = sshll.u32 %s1060_s2, 4  ;;  %s776_s23 = int_to_ptr.vmem [resolvable:$true] %s775_s23 }
 0x6b3   :  { %s1001_s24 = scalar_lea.vmem %s776_s23, 128  ;;  %p1006_p1 = scmp.lt.s32.totalorder %s776_s23, %s776_s23 }
 0x6b4   :  { %965 = vmatpush3.bf16.msra.mxu0 %v964_v49  ;;  %p1002_p0 = scmp.ne.s32.totalorder %s776_s23, %s1001_s24  ;;  %p1007_p2 = scmp.lt.s32.totalorder %s1001_s24, %s1001_s24 }
 0x6b6   :  { %p1008_p3 = por %p1007_p2, %p1006_p1 }
 0x6b8   :  { %p1009_p4 = pnand %p1008_p3, %p1002_p0 }
 0x6bb   :  { %v998_v44 = vpop.eup %997 }
 0x6bc   :  { %v555_v45 = vmul.f32 %v998_v44, %v547_v5 }
 0x6be   :  { %v560_v46 = vmul.f32 %v559_v43, %v555_v45 }
 0x6c0   :  { %v565_v47 = vadd.f32 %v564_v3, %v560_v46 }
 0x6c2   :  { %887 = vmatmul.mubr.msk.f32.vlgmr.msra.gmra.mrb[10].mxu1 %vm31_vm1, %v565_v47 }
 0x795   :  { %v639_v52 = vpop.f32.mrb[10].mxu1 }
 0x796   :  { %v640_v53 = vadd.f32 %v639_v52, %v569_v51  ;;  %v888_v54 = vpop.f32.mrb[11].mxu1 }
 0x798   :  { %v643_v55 = vmax.f32 %v640_v53, 0.0 }
 0x79a   :  { %922 = vmatmul.mubr.f32.vlgmr.msra.gmra.mrb[2].mxu0 %v643_v55 }
 0x86d   :  { %v730_v60 = vpop.f32.mrb[2].mxu0 }
 0x86e   :  { %v731_v61 = vadd.f32 %v730_v60, %v663_v58  ;;  %v923_v62 = vpop.f32.mrb[3].mxu0 }
 0x870   :  { %v734_v63 = vadd.f32 %v731_v61, %v565_v47 }
 0x872   :  { %v735_v0 = vsel %vm31_vm1, %v734_v63, 0.0 }
 0x873   :  { %736 = vadd.xlane.f32.xlu0 %v735_v0 }
 0x900   :  { %v737_v1 = vpop.xlane.xlu0 %736 }
 0x901   :  { %v738_v2 = vmul.f32 0.03125, %v737_v1 }
 0x903   :  { %v739_v4 = vsub.f32 %v734_v63, %v738_v2 }
 0x905   :  { %v740_v5 = vmul.f32 %v739_v4, %v739_v4 }
 0x907   :  { %v741_v6 = vsel %vm31_vm1, %v740_v5, 0.0 }
 0x908   :  { %742 = vadd.xlane.f32.xlu0 %v741_v6 }
 0x909   :  { %1012 = shalt.err (!%p1009_p4)
}
 0x90a   :  { %s1013_s1 = scalar_lea.hbm %s1299_s5, 128 }
 0x90b   :  { %p1014_p5 = scmp.ne.s32.totalorder %s1299_s5, %s1013_s1  ;;  %p1017_p6 = scmp.lt.u32.totalorder %s1013_s1, %s1299_s5 }
 0x90d   :  { %p1019_p7 = pnand %p1017_p6, %p1014_p5 }
 0x90f   :  { %1022 = shalt.err (!%p1019_p7)
}
 0x910   :  { %778 = dma.vmem_to_hbm [thread:$0]  %s776_s23, 128, %s1299_s5, [#allocation5]   ;;  %v750_v10 = vsub.s32 5, %v1171_v57  ;;  %v755_v11 = vsub.s32 6, %v1171_v57 }
 0x911   :  { %s1061_s7 = smov [#allocation2]  }
 0x912   :  { %v751_v12 = vrot.slane %v1177_v59, %v750_v10  ;;  %v756_v15 = vrot.slane %v1177_v59, %v755_v11  ;;  %s765_s8 = sshll.u32 %s1061_s7, 4  ;;  %s766_s8 = int_to_ptr.vmem [resolvable:$true] %s765_s8 }
 0x913   :  { %s1023_s5 = scalar_lea.vmem %s766_s8, 128  ;;  %p1028_p9 = scmp.lt.s32.totalorder %s766_s8, %s766_s8 }
 0x914   :  { %p1024_p8 = scmp.ne.s32.totalorder %s766_s8, %s1023_s5  ;;  %p1029_p10 = scmp.lt.s32.totalorder %s1023_s5, %s1023_s5 }
 0x916   :  { %p1030_p11 = por %p1029_p10, %p1028_p9 }
 0x918   :  { %p1031_p12 = pnand %p1030_p11, %p1024_p8 }
 0x995   :  { %v743_v7 = vpop.xlane.xlu0 %742 }
 0x996   :  { %v744_v8 = vmul.f32 0.03125, %v743_v7 }
 0x998   :  { %v745_v9 = vadd.f32 1e-05, %v744_v8 }
 0x99a   :  { %999 = vrsqrt.f32 %v745_v9 }
 0x9a4   :  { %v1000_v13 = vpop.eup %999 }
 0x9a5   :  { %v747_v14 = vmul.f32 %v1000_v13, %v739_v4 }
 0x9a7   :  { %v752_v16 = vmul.f32 %v751_v12, %v747_v14 }
 0x9a9   :  { %v757_v17 = vadd.f32 %v756_v15, %v752_v16 }
 0x9ab   :  { %758 = vst.msk [vmem:[#allocation2] sm:$0xff] %vm31_vm1, %v757_v17 }
 0x9ac   :  { %1034 = shalt.err (!%p1031_p12)
}
 0x9ad   :  { %s1035_s11 = scalar_lea.hbm %s1298_s4, 128 }
 0x9ae   :  { %p1036_p13 = scmp.ne.s32.totalorder %s1298_s4, %s1035_s11  ;;  %p1039_p0 = scmp.lt.u32.totalorder %s1035_s11, %s1298_s4 }
 0x9b0   :  { %p1041_p1 = pnand %p1039_p0, %p1036_p13 }
 0x9b2   :  { %1044 = shalt.err (!%p1041_p1)
}
 0x9b3   :  { %768 = dma.vmem_to_hbm [thread:$0]  %s766_s8, 128, %s1298_s4, [#allocation3]  }
 0x9b4   :  { %1045 = dma.done.wait [#allocation3], 128  }
 0x9b5   :  { %1046 = vsyncadd [#allocation3], 4294967168 }
 0x9b6   :  { %1047 = dma.done.wait [#allocation5], 128  }
 0x9b7   :  { %1048 = vsyncadd [#allocation5], 4294967168 }
 0x9b8   :  { %785 = vsyncpa [#allocation3], 1 }
 0x9b9   :  { %786 = vsyncpa [#allocation5], 1 }

</bundles_post_ra>
